<compile_context>
chip_gen: v5e
topology: v5e:2x2
jax: 0.10.0
libtpu: 0.0.40
codegen_flags: <defaults>
</compile_context>

<pallas_src>
import functools
import math

import jax
import jax.numpy as jnp
from jax.experimental import pallas as pl
from jax.experimental.pallas import tpu as pltpu

_HIGHEST = jax.lax.Precision.HIGHEST


# ------------------------- kernel A: time weights (no batch dependence) ----

def _weights_kernel(times_ref, mu_ref, sigma_ref, p_ref, tw_ref, *, two_k):
    # times_ref: (1, DT)   mu_ref/sigma_ref/tw_ref: (R, DT)   p_ref: (DT, DT)
    t = times_ref[...]                      # (1, DT)
    mu = mu_ref[...]                        # (R, DT)
    sig = sigma_ref[...]                    # (R, DT)

    dist = t - mu                           # (R, DT)
    half = sig * sig * 0.5                  # window_half = sigma**2 / 2

    # unitboxcar via two logistic heavisides (EUP transcendentals).
    w = (jax.nn.sigmoid(two_k * (dist + half))
         - jax.nn.sigmoid(two_k * (dist - half)))            # (R, DT)

    # Per-detector sum over the T lanes of each segment, scattered back across
    # the segment, via one small MXU dot against the block-diagonal ones
    # matrix P[l, l'] = (l // T == l' // T).  No masked loops.
    denom = jnp.dot(w, p_ref[...], preferred_element_type=jnp.float32,
                    precision=_HIGHEST)                       # (R, DT)

    # torch: .div(sum.clamp(1))
    tw_ref[...] = w / jnp.maximum(denom, 1.0)
    # TODO(synk): optional `mask` argument of TimeAgg.forward (mask=None path
    # implemented) and the NaN check / ValueError have no Pallas equivalent.


# ------------------------- kernel B: batched weighted time reduction -------

def _reduce_kernel(x_ref, tw_ref, seg_ref, out_ref):
    # x_ref: (rows_tile, DT) native dtype   tw_ref: (rows_tile, DT) f32
    # seg_ref: (DT, D) static 0/1           out_ref: (rows_tile, D) f32
    prod = x_ref[...] * tw_ref[...]         # promotes bf16 x lazily; f32 here
    if prod.dtype != jnp.float32:
        prod = prod.astype(jnp.float32)
    # Segmented time-sum on the MXU: out[row, d] = sum_t prod[row, d*T + t].
    out_ref[...] = jnp.dot(prod, seg_ref[...],
                           preferred_element_type=jnp.float32,
                           precision=_HIGHEST)


# ------------------------- wrapper ------------------------------------------

def _round_up(n, m):
    return ((n + m - 1) // m) * m


def time_agg(x, times, mu, sigma, k=1.0, block_bytes=4 * 1024 * 1024):
    """Returns (x_abun (B,R,D), time_wts (R,D,T)) exactly like TimeAgg.forward."""
    B, R, D, T = x.shape
    DT = D * T
    rows = B * R
    two_k = 2.0 * float(k)                  # trace-time constant

    f32 = jnp.float32
    # Lane-dense parameter layout: lane l = d*T + t.
    times_b = jnp.tile(times.astype(f32), D).reshape(1, DT)      # (1, DT)
    mu_b = jnp.repeat(mu.astype(f32), T, axis=-1)                # (R, DT)
    sigma_b = jnp.repeat(sigma.astype(f32), T, axis=-1)          # (R, DT)

    # Static segment matrices (built once on host / in XLA; tiny).
    det_of_lane = jnp.arange(DT) // T
    seg = (det_of_lane[:, None] == jnp.arange(D)[None, :]).astype(f32)   # (DT, D)
    p_blockdiag = (det_of_lane[:, None] == det_of_lane[None, :]).astype(f32)  # (DT, DT)

    vmem = pl.BlockSpec(memory_space=pltpu.MemorySpace.VMEM)

    # --- kernel A: time weights, one tiny invocation, lane-dense (R, DT) ---
    tw_flat = pl.pallas_call(
        functools.partial(_weights_kernel, two_k=two_k),
        out_shape=jax.ShapeDtypeStruct((R, DT), f32),
        in_specs=[vmem, vmem, vmem, vmem],
        out_specs=vmem,
    )(times_b, mu_b, sigma_b, p_blockdiag)

    # --- kernel B: (B*R)-row flattened, MXU segment reduction over time ----
    q = (8 * R) // math.gcd(8, R)           # row-tile quantum: lcm(8, R)
    rows_pad = _round_up(rows, q)
    x_rows = x.reshape(rows, DT)            # contiguous reshape; native dtype
    if rows_pad != rows:
        x_rows = jnp.pad(x_rows, ((0, rows_pad - rows), (0, 0)))

    bytes_per_row = DT * x_rows.dtype.itemsize
    rows_tile = max(q, (block_bytes // bytes_per_row) // q * q)
    rows_tile = min(rows_tile, rows_pad)
    grid = (pl.cdiv(rows_pad, rows_tile),)

    # Replicate tw to one full row tile so the kernel has no broadcast work.
    # (row r of a tile has rule index r % R because rows_tile % R == 0.)
    tw_rows = jnp.tile(tw_flat, (rows_tile // R, 1))             # (rows_tile, DT)

    out = pl.pallas_call(
        _reduce_kernel,
        out_shape=jax.ShapeDtypeStruct((rows_pad, D), f32),
        grid=grid,
        in_specs=[pl.BlockSpec((rows_tile, DT), lambda i: (i, 0)),
                  pl.BlockSpec((rows_tile, DT), lambda i: (0, 0)),  # fetched once
                  pl.BlockSpec((DT, D), lambda i: (0, 0))],         # fetched once
        out_specs=pl.BlockSpec((rows_tile, D), lambda i: (i, 0)),
        compiler_params=pltpu.CompilerParams(
            dimension_semantics=("parallel",),
            vmem_limit_bytes=32 * 1024 * 1024),
    )(x_rows, tw_rows, seg)

    # Partial / padded tail rows compute on padded data and are sliced away.
    x_abun = out[:rows].reshape(B, R, D)
    return x_abun, tw_flat.reshape(R, D, T)


# ------------------------- reference & self-test -----------------------------

def _reference(x, times, mu, sigma, k=1.0):
    dist = times[None, None, :] - mu[:, :, None]
    half = (sigma ** 2)[:, :, None] / 2.0
    w = (jax.nn.sigmoid(2.0 * k * (dist + half))
         - jax.nn.sigmoid(2.0 * k * (dist - half)))
    tw = w / jnp.maximum(jnp.sum(w, axis=-1, keepdims=True), 1.0)
    return jnp.sum(x * tw[None], axis=-1), tw


if __name__ == "__main__":
    # Small shapes consistent with the module: num_rules=4, num_detectors=8,
    # num_time=16, batch=2  (D*T = 128 -> perfectly lane-dense).
    B, R, D, T = 2, 4, 8, 16

    key = jax.random.PRNGKey(0)
    kx, kmu, ksig = jax.random.split(key, 3)

    times = jnp.arange(T, dtype=jnp.float32)                       # buffer 'times'
    mu = jax.random.uniform(kmu, (R, D), jnp.float32, 0.0, T - 1)  # window centers
    sigma = jnp.sqrt(jax.random.uniform(ksig, (R, D), jnp.float32, 2.0, T / 2.0))
    x = jax.random.normal(kx, (B, R, D, T), jnp.float32)

    x_abun, time_wts = time_agg(x, times, mu, sigma, k=1.0)
    jax.block_until_ready((x_abun, time_wts))

    ref_abun, ref_wts = _reference(x, times, mu, sigma, k=1.0)
    assert x_abun.shape == (B, R, D) and time_wts.shape == (R, D, T)
    assert jnp.allclose(x_abun, ref_abun, atol=1e-5, rtol=1e-5)
    assert jnp.allclose(time_wts, ref_wts, atol=1e-5, rtol=1e-5)

    print("KERNEL_OK")
</pallas_src>

<mosaic_0001>
module attributes {stable_mosaic.version = 11 : i64} {
  func.func @_weights_kernel(%arg0: memref<1x128xf32, #tpu.memory_space<vmem>>, %arg1: memref<4x128xf32, #tpu.memory_space<vmem>>, %arg2: memref<4x128xf32, #tpu.memory_space<vmem>>, %arg3: memref<128x128xf32, #tpu.memory_space<vmem>>, %arg4: memref<4x128xf32, #tpu.memory_space<vmem>>) attributes {dimension_semantics = [], scalar_prefetch = 0 : i64, scratch_operands = 0 : i64, tpu.core_type = #tpu.core_type<tc>} {
    %c0 = arith.constant 0 : index
    %c0_0 = arith.constant 0 : index
    %0 = vector.load %arg0[%c0, %c0_0] : memref<1x128xf32, #tpu.memory_space<vmem>>, vector<1x128xf32>
    %c0_1 = arith.constant 0 : index
    %c0_2 = arith.constant 0 : index
    %1 = vector.load %arg1[%c0_1, %c0_2] : memref<4x128xf32, #tpu.memory_space<vmem>>, vector<4x128xf32>
    %c0_3 = arith.constant 0 : index
    %c0_4 = arith.constant 0 : index
    %2 = vector.load %arg2[%c0_3, %c0_4] : memref<4x128xf32, #tpu.memory_space<vmem>>, vector<4x128xf32>
    %3 = vector.broadcast %0 : vector<1x128xf32> to vector<4x128xf32>
    %4 = arith.subf %3, %1 : vector<4x128xf32>
    %5 = arith.mulf %2, %2 : vector<4x128xf32>
    %cst = arith.constant 5.000000e-01 : f32
    %6 = vector.broadcast %cst : f32 to vector<4x128xf32>
    %7 = arith.mulf %5, %6 : vector<4x128xf32>
    %8 = arith.addf %4, %7 : vector<4x128xf32>
    %cst_5 = arith.constant 2.000000e+00 : f32
    %9 = vector.broadcast %cst_5 : f32 to vector<4x128xf32>
    %10 = arith.mulf %9, %8 : vector<4x128xf32>
    %11 = arith.negf %10 : vector<4x128xf32>
    %12 = math.exp %11 : vector<4x128xf32>
    %cst_6 = arith.constant 1.000000e+00 : f32
    %13 = vector.broadcast %cst_6 : f32 to vector<4x128xf32>
    %14 = arith.addf %13, %12 : vector<4x128xf32>
    %15 = arith.divf %13, %14 : vector<4x128xf32>
    %16 = arith.subf %4, %7 : vector<4x128xf32>
    %cst_7 = arith.constant 2.000000e+00 : f32
    %17 = vector.broadcast %cst_7 : f32 to vector<4x128xf32>
    %18 = arith.mulf %17, %16 : vector<4x128xf32>
    %19 = arith.negf %18 : vector<4x128xf32>
    %20 = math.exp %19 : vector<4x128xf32>
    %cst_8 = arith.constant 1.000000e+00 : f32
    %21 = vector.broadcast %cst_8 : f32 to vector<4x128xf32>
    %22 = arith.addf %21, %20 : vector<4x128xf32>
    %23 = arith.divf %21, %22 : vector<4x128xf32>
    %24 = arith.subf %15, %23 : vector<4x128xf32>
    %c0_9 = arith.constant 0 : index
    %c0_10 = arith.constant 0 : index
    %25 = vector.load %arg3[%c0_9, %c0_10] : memref<128x128xf32, #tpu.memory_space<vmem>>, vector<128x128xf32>
    %cst_11 = arith.constant dense<0.000000e+00> : vector<4x128xf32>
    %26 = tpu.matmul %24, %25, %cst_11 {dimension_numbers = #tpu.dot_dimension_numbers<[1], [0], [0], [1], [0, 0, 1, 1], [], []>, precision = #tpu.contract_precision<fp32>} : vector<4x128xf32>, vector<128x128xf32>, vector<4x128xf32> -> vector<4x128xf32>
    %cst_12 = arith.constant 1.000000e+00 : f32
    %27 = vector.broadcast %cst_12 : f32 to vector<4x128xf32>
    %28 = arith.maximumf %26, %27 : vector<4x128xf32>
    %29 = arith.divf %24, %28 : vector<4x128xf32>
    %c0_13 = arith.constant 0 : index
    %c0_14 = arith.constant 0 : index
    %30 = vector.load %arg4[%c0_13, %c0_14] : memref<4x128xf32, #tpu.memory_space<vmem>>, vector<4x128xf32>
    tpu.vector_store %arg4[%c0_13, %c0_14], %29 {strides = array<i32>} : memref<4x128xf32, #tpu.memory_space<vmem>>, vector<4x128xf32>,
    return
  }
}

</mosaic_0001>

<bundles_post_ra>
// kernel: tpu_custom_call.1
= control target key start
LH: loop header
LB: loop body
LE: loop exit
PB: predicated region body
PF: predicated region fallthrough
CT: control target
= control target key end

     0   :  { %9 = vsyncpa [#allocation3], 0  ;;  %s956_s0 = inlined_call_operand.hbm [shape: f32[1,128], index: 0, kind: input, shape index: {}]   ;;  %s957_s1 = inlined_call_operand.hbm [shape: f32[4,128], index: 1, kind: input, shape index: {}]   ;;  %s958_s2 = inlined_call_operand.hbm [shape: f32[4,128], index: 2, kind: input, shape index: {}]   ;;  %s959_s3 = inlined_call_operand.hbm [shape: f32[128,128], index: 3, kind: input, shape index: {}]   ;;  %s960_s4 = inlined_call_operand.hbm [shape: f32[4,128], index: 4, kind: output, shape index: {}]  }
   0x1   :  { %10 = vsyncpa [#allocation6], 0 }
   0x2   :  { %11 = vsyncpa [#allocation9], 0  ;;  %s29_s17 = sshll.u32 %s957_s1, 4  ;;  %s30_s17 = int_to_ptr.hbm [resolvable:$true] %s29_s17 }
   0x3   :  { %12 = vsyncpa [#allocation4], 0  ;;  %s668_s18 = smov [#allocation5]   ;;  %s18_s22 = sshll.u32 %s956_s0, 4  ;;  %s19_s22 = int_to_ptr.hbm [resolvable:$true] %s18_s22 }
   0x4   :  { %s31_s19 = sshll.u32 %s668_s18, 4  ;;  %s669_s23 = smov [#allocation2]   ;;  %s32_s19 = int_to_ptr.vmem [resolvable:$true] %s31_s19 }
   0x5   :  { %34 = dma.hbm_to_vmem [thread:$0]  %s30_s17, 64, %s32_s19, [#allocation6]  }
   0x6   :  { %s20_s24 = sshll.u32 %s669_s23, 4  ;;  %s40_s27 = sshll.u32 %s958_s2, 4  ;;  %s21_s24 = int_to_ptr.vmem [resolvable:$true] %s20_s24  ;;  %s41_s27 = int_to_ptr.hbm [resolvable:$true] %s40_s27 }
   0x7   :  { %23 = dma.hbm_to_vmem [thread:$0]  %s19_s22, 16, %s21_s24, [#allocation3]  }
   0x8   :  { %s50_s29 = sshll.u32 %s959_s3, 4  ;;  %s670_s30 = smov [#allocation7]   ;;  %s51_s29 = int_to_ptr.hbm [resolvable:$true] %s50_s29 }
   0x9   :  { %s42_s5 = sshll.u32 %s670_s30, 4  ;;  %s671_s0 = smov [#allocation8]   ;;  %s43_s5 = int_to_ptr.vmem [resolvable:$true] %s42_s5 }
   0xa   :  { %45 = dma.hbm_to_vmem [thread:$0]  %s41_s27, 64, %s43_s5, [#allocation6]  }
   0xb   :  { %s52_s6 = sshll.u32 %s671_s0, 4  ;;  %s672_s7 = smov 128   ;;  %s53_s6 = int_to_ptr.vmem [resolvable:$true] %s52_s6 }
   0xc   :  { %s673_s8 = smov 8  }
   0xd   :  { %58 = dma.hbm_to_vmem [thread:$0]  %s51_s29, 2048, %s53_s6, [#allocation9], %s672_s7, %s672_s7, %s673_s8  }
   0xe   :  { %660 = dma.done.wait [#allocation3], 16  }
   0xf   :  { %661 = vsyncadd [#allocation3], 4294967280 }
  0x10   :  { %662 = dma.done.wait [#allocation6], 128  }
  0x11   :  { %663 = vsyncadd [#allocation6], 4294967168 }
  0x12   :  { %664 = dma.done.wait [#allocation9], 2048  }
  0x13   :  { %665 = vsyncadd [#allocation9], 4294965248  ;;  %v142_v0 = vld [vmem:[#allocation8 + $0x78] sm:$0xff]  ;;  %v141_v1 = vld [vmem:[#allocation8 + $0x70] sm:$0xff]  ;;  %s674_s2 = smov [#allocation10]   ;;  %s508_s11 = sshll.u32 %s960_s4, 4  ;;  %s509_s11 = int_to_ptr.hbm [resolvable:$true] %s508_s11 }
  0x14   :  { %v140_v2 = vld [vmem:[#allocation8 + $0x68] sm:$0xff]  ;;  %v712_v3 = vand.u32 4294901760, %v142_v0  ;;  %v714_v4 = vand.u32 4294901760, %v141_v1  ;;  %v139_v6 = vld [vmem:[#allocation8 + $0x60] sm:$0xff]  ;;  %v138_v7 = vld [vmem:[#allocation8 + $0x58] sm:$0xff]  ;;  %s506_s3 = sshll.u32 %s674_s2, 4  ;;  %s507_s3 = int_to_ptr.vmem [resolvable:$true] %s506_s3 }
  0x15   :  { %v716_v5 = vand.u32 4294901760, %v140_v2  ;;  %v137_v8 = vld [vmem:[#allocation8 + $0x50] sm:$0xff]  ;;  %v718_v9 = vand.u32 4294901760, %v139_v6  ;;  %v720_v10 = vand.u32 4294901760, %v138_v7  ;;  %v136_v12 = vld [vmem:[#allocation8 + $0x48] sm:$0xff]  ;;  %v135_v13 = vld [vmem:[#allocation8 + $0x40] sm:$0xff] }
  0x16   :  { %v722_v11 = vand.u32 4294901760, %v137_v8  ;;  %144 = vmatpush.msra.mxu0 %v712_v3  ;;  %v726_v14 = vsub.f32 %v142_v0, %v712_v3  ;;  %v729_v15 = vsub.f32 %v141_v1, %v714_v4  ;;  %v734_v17 = vand.u32 4294901760, %v136_v12  ;;  %v134_v18 = vld [vmem:[#allocation8 + $0x38] sm:$0xff]  ;;  %340 = vmatpush.msra.mxu3 %v712_v3  ;;  %v133_v26 = vld [vmem:[#allocation8 + $0x30] sm:$0xff]  ;;  %v132_v36 = vld [vmem:[#allocation8 + $0x28] sm:$0xff] }
  0x17   :  { %v732_v16 = vsub.f32 %v140_v2, %v716_v5  ;;  %v738_v19 = vsub.f32 %v139_v6, %v718_v9  ;;  %v741_v20 = vsub.f32 %v138_v7, %v720_v10  ;;  %v750_v25 = vand.u32 4294901760, %v135_v13  ;;  %v131_v42 = vld [vmem:[#allocation8 + $0x20] sm:$0xff]  ;;  %v130_v48 = vld [vmem:[#allocation8 + $0x18] sm:$0xff]  ;;  %v129_v54 = vld [vmem:[#allocation8 + $0x10] sm:$0xff] }
  0x18   :  { %v744_v21 = vsub.f32 %v137_v8, %v722_v11  ;;  %146 = vmatpush.msra.mxu0 %v714_v4  ;;  %v186_v22 = vand.u32 4294901760, %v726_v14  ;;  %v192_v23 = vand.u32 4294901760, %v729_v15  ;;  %287 = vmatpush.msra.mxu2 %v726_v14  ;;  %v754_v28 = vand.u32 4294901760, %v134_v18  ;;  %v128_v60 = vld [vmem:[#allocation8 + $0x8] sm:$0xff]  ;;  %v127_v61 = vld [vmem:[#allocation8] sm:$0xff] }
  0x19   :  { %v198_v24 = vand.u32 4294901760, %v732_v16  ;;  %v204_v27 = vand.u32 4294901760, %v738_v19  ;;  %v757_v29 = vsub.f32 %v136_v12, %v734_v17  ;;  %342 = vmatpush.msra.mxu3 %v714_v4  ;;  %v210_v33 = vand.u32 4294901760, %v741_v20  ;;  %v529_v62 = vld [vmem:[#allocation2] ss:$0 sm:$0xff] }
  0x1a   :  { %148 = vmatpush.msra.mxu0 %v716_v5  ;;  %v187_v30 = vsub.f32 %v726_v14, %v186_v22  ;;  %v193_v31 = vsub.f32 %v729_v15, %v192_v23  ;;  %290 = vmatpush.msra.mxu2 %v729_v15  ;;  %v216_v34 = vand.u32 4294901760, %v744_v21  ;;  %v773_v35 = vand.u32 4294901760, %v133_v26  ;;  %v76_v6 = vld [vmem:[#allocation5] sm:$0xf]  ;;  %v77_v7 = vld [vmem:[#allocation7] sm:$0xf] }
  0x1b   :  { %v199_v32 = vsub.f32 %v732_v16, %v198_v24  ;;  %344 = vmatpush.msra.mxu3 %v716_v5  ;;  %v205_v39 = vsub.f32 %v738_v19, %v204_v27  ;;  %v781_v40 = vsub.f32 %v135_v13, %v750_v25  ;;  %v222_v41 = vand.u32 4294901760, %v757_v29 }
  0x1c   :  { %v188_v37 = vand.u32 4294901760, %v187_v30  ;;  %150 = vmatpush.msra.mxu0 %v718_v9  ;;  %v194_v38 = vand.u32 4294901760, %v193_v31  ;;  %293 = vmatpush.msra.mxu2 %v732_v16  ;;  %v211_v44 = vsub.f32 %v741_v20, %v210_v33  ;;  %v790_v45 = vand.u32 4294901760, %v132_v36 }
  0x1d   :  { %346 = vmatpush.msra.mxu3 %v718_v9  ;;  %v200_v43 = vand.u32 4294901760, %v199_v32  ;;  %v793_v46 = vsub.f32 %v134_v18, %v754_v28  ;;  %v217_v47 = vsub.f32 %v744_v21, %v216_v34  ;;  %v206_v49 = vand.u32 4294901760, %v205_v39 }
  0x1e   :  { %189 = vmatpush.msra.mxu1 %v188_v37  ;;  %152 = vmatpush.msra.mxu0 %v720_v10  ;;  %v228_v50 = vand.u32 4294901760, %v781_v40  ;;  %v802_v51 = vand.u32 4294901760, %v131_v42  ;;  %v805_v52 = vsub.f32 %v133_v26, %v773_v35  ;;  %v223_v53 = vsub.f32 %v757_v29, %v222_v41 }
  0x1f   :  { %296 = vmatpush.msra.mxu2 %v738_v19  ;;  %348 = vmatpush.msra.mxu3 %v720_v10  ;;  %v212_v55 = vand.u32 4294901760, %v211_v44  ;;  %v234_v56 = vand.u32 4294901760, %v793_v46  ;;  %v814_v57 = vand.u32 4294901760, %v130_v48  ;;  %v817_v58 = vsub.f32 %v132_v36, %v790_v45 }
  0x20   :  { %195 = vmatpush.msra.mxu1 %v194_v38  ;;  %154 = vmatpush.msra.mxu0 %v722_v11  ;;  %v218_v59 = vand.u32 4294901760, %v217_v47  ;;  %v229_v63 = vsub.f32 %v781_v40, %v228_v50  ;;  %v240_v0 = vand.u32 4294901760, %v805_v52  ;;  %v826_v1 = vand.u32 4294901760, %v129_v54 }
  0x21   :  { %299 = vmatpush.msra.mxu2 %v741_v20  ;;  %350 = vmatpush.msra.mxu3 %v722_v11  ;;  %v829_v2 = vsub.f32 %v131_v42, %v802_v51  ;;  %v224_v8 = vand.u32 4294901760, %v223_v53  ;;  %v235_v12 = vsub.f32 %v793_v46, %v234_v56  ;;  %v246_v13 = vand.u32 4294901760, %v817_v58 }
  0x22   :  { %201 = vmatpush.msra.mxu1 %v200_v43  ;;  %156 = vmatpush.msra.mxu0 %v734_v17  ;;  %v838_v18 = vand.u32 4294901760, %v128_v60  ;;  %v841_v26 = vsub.f32 %v130_v48, %v814_v57  ;;  %v843_v30 = vand.u32 4294901760, %v127_v61  ;;  %v81_v31 = vsub.f32 %v529_v62, %v76_v6 }
  0x23   :  { %302 = vmatpush.msra.mxu2 %v744_v21  ;;  %352 = vmatpush.msra.mxu3 %v734_v17  ;;  %v82_v32 = vmul.f32 %v77_v7, %v77_v7  ;;  %v230_v36 = vand.u32 4294901760, %v229_v63  ;;  %v241_v37 = vsub.f32 %v805_v52, %v240_v0  ;;  %v252_v38 = vand.u32 4294901760, %v829_v2 }
  0x24   :  { %207 = vmatpush.msra.mxu1 %v206_v49  ;;  %158 = vmatpush.msra.mxu0 %v750_v25  ;;  %v853_v39 = vsub.f32 %v129_v54, %v826_v1  ;;  %v236_v43 = vand.u32 4294901760, %v235_v12  ;;  %v247_v44 = vsub.f32 %v817_v58, %v246_v13  ;;  %v258_v47 = vand.u32 4294901760, %v841_v26 }
  0x25   :  { %305 = vmatpush.msra.mxu2 %v757_v29  ;;  %354 = vmatpush.msra.mxu3 %v750_v25  ;;  %v83_v42 = vmul.f32 0.5, %v82_v32  ;;  %v863_v48 = vsub.f32 %v128_v60, %v838_v18  ;;  %v242_v54 = vand.u32 4294901760, %v241_v37  ;;  %v873_v62 = vsub.f32 %v127_v61, %v843_v30 }
  0x26   :  { %213 = vmatpush.msra.mxu1 %v212_v55  ;;  %160 = vmatpush.msra.mxu0 %v754_v28  ;;  %v253_v55 = vsub.f32 %v829_v2, %v252_v38  ;;  %v248_v6 = vand.u32 4294901760, %v247_v44  ;;  %v259_v7 = vsub.f32 %v841_v26, %v258_v47 }
  0x27   :  { %308 = vmatpush.msra.mxu2 %v781_v40  ;;  %356 = vmatpush.msra.mxu3 %v754_v28  ;;  %v84_v49 = vadd.f32 %v83_v42, %v81_v31  ;;  %v105_v53 = vsub.f32 %v81_v31, %v83_v42 }
  0x28   :  { %219 = vmatpush.msra.mxu1 %v218_v59  ;;  %162 = vmatpush.msra.mxu0 %v773_v35  ;;  %v264_v59 = vand.u32 4294901760, %v853_v39  ;;  %v254_v31 = vand.u32 4294901760, %v253_v55  ;;  %v260_v37 = vand.u32 4294901760, %v259_v7 }
  0x29   :  { %311 = vmatpush.msra.mxu2 %v793_v46  ;;  %358 = vmatpush.msra.mxu3 %v773_v35  ;;  %v520_v60 = vmul.f32 -2.0, %v84_v49  ;;  %v521_v63 = vmul.f32 -2.0, %v105_v53 }
  0x2a   :  { %225 = vmatpush.msra.mxu1 %v224_v8  ;;  %164 = vmatpush.msra.mxu0 %v790_v45  ;;  %v270_v8 = vand.u32 4294901760, %v863_v48  ;;  %v265_v32 = vsub.f32 %v853_v39, %v264_v59 }
  0x2b   :  { %314 = vmatpush.msra.mxu2 %v805_v52  ;;  %360 = vmatpush.msra.mxu3 %v790_v45  ;;  %v87_v61 = vmul.f32 1.442695, %v520_v60  ;;  %v108_v12 = vmul.f32 1.442695, %v521_v63 }
  0x2c   :  { %231 = vmatpush.msra.mxu1 %v230_v36  ;;  %166 = vmatpush.msra.mxu0 %v802_v51  ;;  %v276_v36 = vand.u32 4294901760, %v873_v62  ;;  %v271_v42 = vsub.f32 %v863_v48, %v270_v8 }
  0x2d   :  { %317 = vmatpush.msra.mxu2 %v817_v58  ;;  %362 = vmatpush.msra.mxu3 %v802_v51  ;;  %530 = vpow2.f32 %v87_v61 }
  0x2e   :  { %237 = vmatpush.msra.mxu1 %v236_v43  ;;  %168 = vmatpush.msra.mxu0 %v814_v57  ;;  %532 = vpow2.f32 %v108_v12  ;;  %v266_v43 = vand.u32 4294901760, %v265_v32  ;;  %v277_v44 = vsub.f32 %v873_v62, %v276_v36  ;;  %v272_v49 = vand.u32 4294901760, %v271_v42 }
  0x2f   :  { %320 = vmatpush.msra.mxu2 %v829_v2  ;;  %364 = vmatpush.msra.mxu3 %v814_v57 }
  0x30   :  { %243 = vmatpush.msra.mxu1 %v242_v54  ;;  %170 = vmatpush.msra.mxu0 %v826_v1  ;;  %v278_v55 = vand.u32 4294901760, %v277_v44 }
  0x31   :  { %323 = vmatpush.msra.mxu2 %v841_v26  ;;  %366 = vmatpush.msra.mxu3 %v826_v1 }
  0x32   :  { %249 = vmatpush.msra.mxu1 %v248_v6  ;;  %172 = vmatpush.msra.mxu0 %v838_v18 }
  0x33   :  { %326 = vmatpush.msra.mxu2 %v853_v39  ;;  %368 = vmatpush.msra.mxu3 %v838_v18  ;;  %v531_v53 = vpop.eup %530 }
  0x34   :  { %255 = vmatpush.msra.mxu1 %v254_v31  ;;  %174 = vmatpush.msra.mxu0 %v843_v30  ;;  %v533_v54 = vpop.eup %532  ;;  %v89_v60 = vadd.f32 1.0, %v531_v53 }
  0x35   :  { %329 = vmatpush.msra.mxu2 %v863_v48  ;;  %370 = vmatpush.msra.mxu3 %v843_v30  ;;  %v110_v14 = vadd.f32 1.0, %v533_v54 }
  0x36   :  { %381 = vmatpush.msrb.mxu0 %v186_v22  ;;  %261 = vmatpush.msra.mxu1 %v260_v37  ;;  %534 = vrcp.f32 %v89_v60  ;;  %vm95_vm0 = vweird.f32 %v89_v60  ;;  %v101_v22 = vand.u32 2147483648, %v89_v60 }
  0x37   :  { %332 = vmatpush.msra.mxu2 %v873_v62  ;;  %536 = vrcp.f32 %v110_v14  ;;  %v122_v20 = vand.u32 2147483648, %v110_v14  ;;  %vm116_vm2 = vweird.f32 %v110_v14 }
  0x38   :  { %385 = vmatpush.msrb.mxu0 %v192_v23  ;;  %267 = vmatpush.msra.mxu1 %v266_v43 }
  0x3a   :  { %389 = vmatpush.msrb.mxu0 %v198_v24  ;;  %273 = vmatpush.msra.mxu1 %v272_v49 }
  0x3c   :  { %393 = vmatpush.msrb.mxu0 %v204_v27  ;;  %279 = vmatpush.msra.mxu1 %v278_v55  ;;  %v535_v15 = vpop.eup %534 }
  0x3d   :  { %v537_v16 = vpop.eup %536  ;;  %v91_v19 = vmul.f32 %v535_v15, %v89_v60  ;;  %vm96_vm1 = vweird.f32 %v535_v15 }
  0x3e   :  { %448 = vmatpush.msrb.mxu1 %v712_v3  ;;  %397 = vmatpush.msrb.mxu0 %v210_v33  ;;  %v112_v23 = vmul.f32 %v537_v16, %v110_v14  ;;  %vm117_vm3 = vweird.f32 %v537_v16  ;;  %vm97_vm4 = vmor %vm95_vm0, %vm96_vm1  ;;  %v123_v33 = vor.u32 1.1754944e-38, %v122_v20 }
  0x3f   :  { %v92_v3 = vsub.f32 1.0, %v91_v19  ;;  %vm118_vm6 = vmor %vm116_vm2, %vm117_vm3 }
  0x40   :  { %450 = vmatpush.msrb.mxu1 %v714_v4  ;;  %401 = vmatpush.msrb.mxu0 %v216_v34  ;;  %v99_v4 = vand.u32 2147483647, %v89_v60  ;;  %v113_v21 = vsub.f32 1.0, %v112_v23 }
  0x41   :  { %v93_v24 = vmul.f32 %v535_v15, %v92_v3 }
  0x42   :  { %452 = vmatpush.msrb.mxu1 %v716_v5  ;;  %405 = vmatpush.msrb.mxu0 %v222_v41  ;;  %v120_v5 = vand.u32 2147483647, %v110_v14  ;;  %v114_v27 = vmul.f32 %v537_v16, %v113_v21  ;;  %vm100_vm5 = vcmp.eq.f32.partialorder %v99_v4, 8.507059e+37 }
  0x43   :  { %v94_v29 = vadd.f32 %v535_v15, %v93_v24 }
  0x44   :  { %454 = vmatpush.msrb.mxu1 %v718_v9  ;;  %409 = vmatpush.msrb.mxu0 %v228_v50  ;;  %v102_v9 = vor.u32 1.1754944e-38, %v101_v22  ;;  %v115_v34 = vadd.f32 %v537_v16, %v114_v27  ;;  %vm121_vm7 = vcmp.eq.f32.partialorder %v120_v5, 8.507059e+37 }
  0x46   :  { %456 = vmatpush.msrb.mxu1 %v720_v10  ;;  %413 = vmatpush.msrb.mxu0 %v234_v56  ;;  %v98_v10 = vsel %vm97_vm4, %v535_v15, %v94_v29  ;;  %v119_v41 = vsel %vm118_vm6, %v537_v16, %v115_v34 }
  0x47   :  { %v103_v40 = vsel %vm100_vm5, %v102_v9, %v98_v10 }
  0x48   :  { %458 = vmatpush.msrb.mxu1 %v722_v11  ;;  %417 = vmatpush.msrb.mxu0 %v240_v0  ;;  %v124_v11 = vsel %vm121_vm7, %v123_v33, %v119_v41 }
  0x49   :  { %v126_v46 = vsub.f32 %v103_v40, %v124_v11 }
  0x4a   :  { %460 = vmatpush.msrb.mxu1 %v734_v17  ;;  %421 = vmatpush.msrb.mxu0 %v246_v13 }
  0x4b   :  { %v175_v50 = vand.u32 4294901760, %v126_v46 }
  0x4c   :  { %462 = vmatpush.msrb.mxu1 %v750_v25  ;;  %425 = vmatpush.msrb.mxu0 %v252_v38 }
  0x4d   :  { %v176_v17 = vsub.f32 %v126_v46, %v175_v50  ;;  %281 = vmatmul.f32.vlgmr.msra.gmra.mxu1 %v175_v50 }
  0x4e   :  { %464 = vmatpush.msrb.mxu1 %v754_v28  ;;  %429 = vmatpush.msrb.mxu0 %v258_v47 }
  0x4f   :  { %335 = vmatmul.f32.vlgmr.msra.gmra.mxu2 %v176_v17  ;;  %v177_v25 = vand.u32 4294901760, %v176_v17 }
  0x50   :  { %466 = vmatpush.msrb.mxu1 %v773_v35  ;;  %433 = vmatpush.msrb.mxu0 %v264_v59 }
  0x51   :  { %v178_v28 = vsub.f32 %v176_v17, %v177_v25  ;;  %374 = vmatmul.f32.vlgmr.msra.gmra.mxu3 %v177_v25 }
  0x52   :  { %468 = vmatpush.msrb.mxu1 %v790_v45  ;;  %437 = vmatpush.msrb.mxu0 %v270_v8 }
  0x53   :  { %v179_v35 = vand.u32 4294901760, %v178_v28 }
  0x54   :  { %470 = vmatpush.msrb.mxu1 %v802_v51  ;;  %441 = vmatpush.msrb.mxu0 %v276_v36 }
  0x55   :  { %180 = vmatmul.f32.vlgmr.msra.gmra.mxu0 %v179_v35 }
  0x56   :  { %472 = vmatpush.msrb.mxu1 %v814_v57 }
  0x58   :  { %474 = vmatpush.msrb.mxu1 %v826_v1 }
  0x5a   :  { %476 = vmatpush.msrb.mxu1 %v838_v18 }
  0x5c   :  { %478 = vmatpush.msrb.mxu1 %v843_v30 }
  0x5d   :  { %480 = vmatmul.f32.vlgmr.msrb.gmra.mxu1 %v175_v50  ;;  %443 = vmatmul.f32.vlgmr.msrb.gmra.mxu0 %v175_v50 }
  0xca   :  { %v282_v45 = vpop.f32.mrf.mxu1 }
  0xd2   :  { %v181_v52 = vpop.f32.mrf.mxu0  ;;  %v336_v51 = vpop.f32.mrf.mxu2 }
  0xd3   :  { %v283_v56 = vadd.f32 %v282_v45, %v181_v52 }
  0xd4   :  { %v375_v58 = vpop.f32.mrf.mxu3 }
  0xd5   :  { %v337_v0 = vadd.f32 %v336_v51, %v283_v56 }
  0xd7   :  { %v376_v2 = vadd.f32 %v375_v58, %v337_v0 }
  0xda   :  { %v444_v13 = vpop.f32.mrf.mxu0  ;;  %v481_v26 = vpop.f32.mrf.mxu1 }
  0xdb   :  { %v445_v57 = vadd.f32 %v444_v13, %v376_v2 }
  0xdd   :  { %v482_v38 = vadd.f32 %v481_v26, %v445_v57 }
  0xdf   :  { %v484_v39 = vmax.f32 %v482_v38, 1.0 }
  0xe1   :  { %538 = vrcp.f32 %v484_v39  ;;  %v496_v48 = vand.u32 2147483648, %v484_v39  ;;  %v494_v59 = vand.u32 2147483647, %v484_v39  ;;  %vm490_vm9 = vweird.f32 %v484_v39 }
  0xe3   :  { %v497_v63 = vor.u32 1.1754944e-38, %v496_v48  ;;  %vm495_vm11 = vcmp.eq.f32.partialorder %v494_v59, 8.507059e+37 }
  0xe7   :  { %v539_v1 = vpop.eup %538 }
  0xe8   :  { %v486_v47 = vmul.f32 %v539_v1, %v484_v39  ;;  %vm491_vm8 = vweird.f32 %v539_v1 }
  0xe9   :  { %vm492_vm10 = vmor %vm490_vm9, %vm491_vm8 }
  0xea   :  { %v487_v18 = vsub.f32 1.0, %v486_v47 }
  0xec   :  { %v488_v30 = vmul.f32 %v539_v1, %v487_v18 }
  0xee   :  { %v489_v62 = vadd.f32 %v539_v1, %v488_v30 }
  0xf0   :  { %v493_v6 = vsel %vm492_vm10, %v539_v1, %v489_v62 }
  0xf1   :  { %v498_v7 = vsel %vm495_vm11, %v497_v63, %v493_v6 }
  0xf2   :  { %v499_v8 = vmul.f32 %v498_v7, %v126_v46 }
  0xf4   :  { %500 = vst [vmem:[#allocation10] sm:$0xf] %v499_v8 }
  0xf5   :  { %511 = dma.vmem_to_hbm [thread:$0]  %s507_s3, 64, %s509_s11, [#allocation4]  }
  0xf6   :  { %666 = dma.done.wait [#allocation4], 64  }
  0xf7   :  { %667 = vsyncadd [#allocation4], 4294967232 }
  0xf8   :  { %516 = vsyncpa [#allocation3], 1 }
  0xf9   :  { %517 = vsyncpa [#allocation6], 1 }
  0xfa   :  { %518 = vsyncpa [#allocation9], 1 }
  0xfb   :  { %519 = vsyncpa [#allocation4], 1 }

</bundles_post_ra>
